<compile_context>
chip_gen: v7x
topology: tpu7x:2x2x1
jax: 0.10.0
libtpu: 0.0.40
codegen_flags: <defaults>
</compile_context>

<pallas_src>
import functools

import jax
import jax.numpy as jnp
from jax.experimental import pallas as pl
from jax.experimental.pallas import tpu as pltpu


# --------------------------------------------------------------------------- helpers
@functools.lru_cache(maxsize=None)
def _roll_matches_jnp_roll() -> bool:
    """True iff pltpu.roll(x, 1, axis) follows jnp.roll semantics (result[i] = x[i-1]).

    Tiny one-time probe so the pair-swap direction is provably correct on the
    actual backend instead of relying on the rotation convention.
    """
    def probe_kernel(x_ref, o_ref):
        o_ref[...] = pltpu.roll(x_ref[...], 1, 1)

    x = jnp.arange(8 * 128, dtype=jnp.float32).reshape(8, 128)
    out = pl.pallas_call(
        probe_kernel, out_shape=jax.ShapeDtypeStruct((8, 128), jnp.float32)
    )(x)
    return bool(out[0, 1] == x[0, 0])


def _pick_row_tile(rows: int, width: int, elem_bytes: int = 4,
                   budget_bytes: int = 2 << 20) -> int:
    """Largest multiple-of-8 divisor of `rows` whose (tile, width) f32 block fits budget."""
    max_rows = max(8, budget_bytes // max(width * elem_bytes, 1))
    if rows <= max_rows or rows % 8 != 0:
        return rows
    cand = min((max_rows // 8) * 8, rows)
    while cand >= 8:
        if rows % cand == 0:
            return cand
        cand -= 8
    return rows  # TODO(synk): pad rows to a multiple of 8 for awkward B*H values


def rope_freqs_table(positions, freqs_param):
    """RotaryEmbedding.forward(t): outer(pos, freqs) with interleaved repeat r=2.

    Tiny (S, D) table -> plain XLA (a dedicated pallas_call here is pure overhead).
    """
    ang = positions.astype(jnp.float32)[:, None] * freqs_param.astype(jnp.float32)[None, :]
    return jnp.repeat(ang, 2, axis=-1)


# --------------------------------------------------------------------------- kernel
def _rope_rotate_kernel(x_ref, cos_ref, sin_fwd_ref, sin_bwd_ref, o_ref,
                        *, prev_shift, next_shift):
    # x_ref:       (R, W)  activation rows, W = S*D (seq folded with interleaved head dim)
    # cos_ref:     (1, W)  cos(angle) * scale
    # sin_fwd_ref: (1, W)  -sin*scale on even lanes, 0 on odd lanes  (pairs with x[j+1])
    # sin_bwd_ref: (1, W)  +sin*scale on odd  lanes, 0 on even lanes (pairs with x[j-1])
    #
    # out[2i]   = x[2i]  *cos_i - x[2i+1]*sin_i
    # out[2i+1] = x[2i+1]*cos_i + x[2i]  *sin_i
    # Circular-wrap lanes of the rolls are multiplied by the zeroed table entries, so
    # the wrap (and the seq-chunk boundaries inside the lane axis) never leak.
    x = x_ref[...].astype(jnp.float32)
    x_next = pltpu.roll(x, next_shift, 1)   # x_next[j] = x[j+1]   (XLU slot)
    x_prev = pltpu.roll(x, prev_shift, 1)   # x_prev[j] = x[j-1]   (XLU slot)
    out = x * cos_ref[...] + x_next * sin_fwd_ref[...] + x_prev * sin_bwd_ref[...]
    o_ref[...] = out.astype(o_ref.dtype)


# --------------------------------------------------------------------------- wrapper
def rotate_queries_or_keys_pallas(t, freqs_param, *, interpolate_factor=1.0,
                                  offset=0, scale=1.0, donate_input=False):
    """Fused RotaryEmbedding.rotate_queries_or_keys for t of shape (B, H, S, D)."""
    B, H, S, D = t.shape
    assert D % 2 == 0, "head dim must be even for rotary pairs"
    assert 2 * freqs_param.shape[0] == D, "rotary dim must cover the full head dim"
    # TODO(synk): partial rotation (rot_dim < head_dim), xpos per-position scale tensors
    #             and the seq_before_head_dim=True layout are not handled by this kernel.
    rows, W = B * H, S * D
    dtype = t.dtype
    x2d = t.reshape(rows, W)   # contiguous flatten: metadata-only, no extra HBM pass

    # Tiny (1, W) lookup tables; rotate_half's sign, pair parity and `scale` are folded
    # in so the kernel body is just 3 multiplies + 2 adds + 2 rolls.
    pos = (jnp.arange(S, dtype=jnp.float32) + float(offset)) / float(interpolate_factor)
    ang = rope_freqs_table(pos, freqs_param)                      # (S, D)
    cos_t = (jnp.cos(ang) * float(scale)).reshape(1, W)
    sin_t = (jnp.sin(ang) * float(scale)).reshape(1, W)
    lane_parity = jnp.arange(W, dtype=jnp.int32) % 2
    sin_fwd = jnp.where(lane_parity == 0, -sin_t, 0.0)   # even lanes need -sin * x[j+1]
    sin_bwd = jnp.where(lane_parity == 1, sin_t, 0.0)    # odd  lanes need +sin * x[j-1]

    # Circular lane-rotation shifts for "previous"/"next" element (positive shifts only).
    if _roll_matches_jnp_roll():
        prev_shift, next_shift = 1, W - 1
    else:
        prev_shift, next_shift = W - 1, 1

    row_tile = _pick_row_tile(rows, W)
    grid = (rows // row_tile,)

    kernel = functools.partial(_rope_rotate_kernel,
                               prev_shift=prev_shift, next_shift=next_shift)
    out2d = pl.pallas_call(
        kernel,
        out_shape=jax.ShapeDtypeStruct((rows, W), dtype),
        grid_spec=pltpu.PrefetchScalarGridSpec(
            num_scalar_prefetch=0,
            grid=grid,
            in_specs=[
                pl.BlockSpec((row_tile, W), lambda i: (i, 0)),   # activation tile
                pl.BlockSpec((1, W), lambda i: (0, 0)),          # cos      (resident)
                pl.BlockSpec((1, W), lambda i: (0, 0)),          # sin_fwd  (resident)
                pl.BlockSpec((1, W), lambda i: (0, 0)),          # sin_bwd  (resident)
            ],
            out_specs=pl.BlockSpec((row_tile, W), lambda i: (i, 0)),
        ),
        compiler_params=pltpu.CompilerParams(
            dimension_semantics=("parallel",)),
        input_output_aliases=({0: 0} if donate_input else {}),
    )(x2d, cos_t, sin_fwd, sin_bwd)
    return out2d.reshape(B, H, S, D)


# --------------------------------------------------------------------------- reference
def rotate_queries_or_keys_ref(t, freqs_param, *, interpolate_factor=1.0,
                               offset=0, scale=1.0):
    """Pure-JAX mirror of the PyTorch module (interleaved rotate_half)."""
    B, H, S, D = t.shape
    pos = (jnp.arange(S, dtype=jnp.float32) + float(offset)) / float(interpolate_factor)
    freqs = rope_freqs_table(pos, freqs_param)            # (S, D)
    cos = jnp.cos(freqs) * float(scale)
    sin = jnp.sin(freqs) * float(scale)
    x = t.astype(jnp.float32).reshape(B, H, S, D // 2, 2)
    x1, x2 = x[..., 0], x[..., 1]
    rot_half = jnp.stack([-x2, x1], axis=-1).reshape(B, H, S, D)
    return (t.astype(jnp.float32) * cos + rot_half * sin).astype(t.dtype)


# ---------------------------------------------------------------------------
if __name__ == "__main__":
    # Module config: RotaryEmbedding(dim=32, freqs_for='lang', theta=10000)
    dim = 32
    theta = 10000.0
    freqs_param = 1.0 / (theta ** (jnp.arange(0, dim, 2, dtype=jnp.float32) / dim))  # (16,)

    B, H, S = 2, 4, 8
    key = jax.random.PRNGKey(0)
    t = jax.random.normal(key, (B, H, S, dim), dtype=jnp.float32)

    # rotate_queries_or_keys(t)
    rotated = jax.block_until_ready(rotate_queries_or_keys_pallas(t, freqs_param))
    rotated_ref = rotate_queries_or_keys_ref(t, freqs_param)
    assert rotated.shape == t.shape and rotated.dtype == t.dtype
    assert jnp.allclose(rotated, rotated_ref, atol=1e-5, rtol=1e-5)

    # offset path (as used by rotate_queries_with_cached_keys: offset = k_len - q_len)
    rotated_off = jax.block_until_ready(
        rotate_queries_or_keys_pallas(t, freqs_param, offset=3))
    rotated_off_ref = rotate_queries_or_keys_ref(t, freqs_param, offset=3)
    assert jnp.allclose(rotated_off, rotated_off_ref, atol=1e-5, rtol=1e-5)

    # module.forward(positions): tiny freqs table, plain XLA per perf review
    table = rope_freqs_table(jnp.arange(S, dtype=jnp.float32), freqs_param)
    assert table.shape == (S, dim)

    print("KERNEL_OK")
</pallas_src>

<mosaic_0001>
module attributes {stable_mosaic.version = 11 : i64} {
  func.func @probe_kernel(%arg0: memref<8x128xf32, #tpu.memory_space<vmem>>, %arg1: memref<8x128xf32, #tpu.memory_space<vmem>>) attributes {dimension_semantics = [], scalar_prefetch = 0 : i64, scratch_operands = 0 : i64, tpu.core_type = #tpu.core_type<tc>} {
    %c0 = arith.constant 0 : index
    %c0_0 = arith.constant 0 : index
    %0 = vector.load %arg0[%c0, %c0_0] : memref<8x128xf32, #tpu.memory_space<vmem>>, vector<8x128xf32>
    %c1_i32 = arith.constant 1 : i32
    %1 = tpu.dynamic_rotate %0 by %c1_i32 dim 1 : vector<8x128xf32>, i32 -> vector<8x128xf32>
    %c0_1 = arith.constant 0 : index
    %c0_2 = arith.constant 0 : index
    %2 = vector.load %arg1[%c0_1, %c0_2] : memref<8x128xf32, #tpu.memory_space<vmem>>, vector<8x128xf32>
    tpu.vector_store %arg1[%c0_1, %c0_2], %1 {strides = array<i32>} : memref<8x128xf32, #tpu.memory_space<vmem>>, vector<8x128xf32>,
    return
  }
}

</mosaic_0001>

<bundles_post_ra>
// kernel: tpu_custom_call.1
= control target key start
LH: loop header
LB: loop body
LE: loop exit
PB: predicated region body
PF: predicated region fallthrough
CT: control target
= control target key end

     0   :  { %6 = vsyncpa [#allocation3], 0  ;;  %s128_s0 = inlined_call_operand.hbm [shape: f32[8,128], index: 0, kind: input, shape index: {}]   ;;  %s129_s1 = inlined_call_operand.hbm [shape: f32[8,128], index: 1, kind: output, shape index: {}]  }
   0x1   :  { %7 = vsyncpa [#allocation4], 0  ;;  %s91_s6 = smov [#allocation2]   ;;  %s43_s10 = scalar_lea.hbm %s128_s0, 128 }
   0x2   :  { %s14_s7 = sshll.u32 %s91_s6, 4  ;;  %p44_p0 = scmp.ne.s32.totalorder %s128_s0, %s43_s10  ;;  %s15_s7 = int_to_ptr.vmem [resolvable:$true] %s14_s7 }
   0x3   :  { %p47_p1 = scmp.lt.u32.totalorder %s43_s10, %s128_s0 }
   0x5   :  { %p49_p2 = pnand %p47_p1, %p44_p0 }
   0x7   :  { %52 = shalt.err (!%p49_p2)
}
   0x8   :  { %s53_s15 = scalar_lea.vmem %s15_s7, 128  ;;  %p58_p4 = scmp.lt.s32.totalorder %s15_s7, %s15_s7 }
   0x9   :  { %p54_p3 = scmp.ne.s32.totalorder %s15_s7, %s53_s15  ;;  %p59_p5 = scmp.lt.s32.totalorder %s53_s15, %s53_s15 }
   0xb   :  { %p60_p6 = por %p59_p5, %p58_p4 }
   0xd   :  { %p61_p7 = pnand %p60_p6, %p54_p3 }
   0xf   :  { %64 = shalt.err (!%p61_p7)
}
  0x10   :  { %17 = dma.hbm_to_vmem [thread:$0]  %s128_s0, 128, %s15_s7, [#allocation3]  }
  0x11   :  { %87 = dma.done.wait [#allocation3], 128  }
  0x12   :  { %88 = vsyncadd [#allocation3], 4294967168  ;;  %v21_v0 = vld [vmem:[#allocation2] sm:$0xff]  ;;  %s92_s18 = smov 1   ;;  %s93_s19 = smov [#allocation5]  }
  0x13   :  { %22 = vrot.lane.b32.xlu0 %v21_v0, %s92_s18  ;;  %s31_s20 = sshll.u32 %s93_s19, 4  ;;  %s32_s20 = int_to_ptr.vmem [resolvable:$true] %s31_s20 }
  0x14   :  { %s65_s21 = scalar_lea.vmem %s32_s20, 128  ;;  %p70_p9 = scmp.lt.s32.totalorder %s32_s20, %s32_s20 }
  0x15   :  { %p66_p8 = scmp.ne.s32.totalorder %s32_s20, %s65_s21  ;;  %p71_p10 = scmp.lt.s32.totalorder %s65_s21, %s65_s21 }
  0x17   :  { %p72_p11 = por %p71_p10, %p70_p9 }
  0x19   :  { %p73_p12 = pnand %p72_p11, %p66_p8 }
  0x85   :  { %v23_v1 = vpop.permute.xlu0 %22 }
  0x86   :  { %24 = vst [vmem:[#allocation5] sm:$0xff] %v23_v1 }
  0x87   :  { %76 = shalt.err (!%p73_p12)
}
  0x88   :  { %s77_s0 = scalar_lea.hbm %s129_s1, 128 }
  0x89   :  { %p78_p13 = scmp.ne.s32.totalorder %s129_s1, %s77_s0  ;;  %p81_p0 = scmp.lt.u32.totalorder %s77_s0, %s129_s1 }
  0x8b   :  { %p83_p1 = pnand %p81_p0, %p78_p13 }
  0x8d   :  { %86 = shalt.err (!%p83_p1)
}
  0x8e   :  { %34 = dma.vmem_to_hbm [thread:$0]  %s32_s20, 128, %s129_s1, [#allocation4]  }
  0x8f   :  { %89 = dma.done.wait [#allocation4], 128  }
  0x90   :  { %90 = vsyncadd [#allocation4], 4294967168 }
  0x91   :  { %38 = vsyncpa [#allocation3], 1 }
  0x92   :  { %39 = vsyncpa [#allocation4], 1 }

</bundles_post_ra>
